<compile_context>
chip_gen: v7x
topology: tpu7x:2x2x1
jax: 0.10.0
libtpu: 0.0.40
codegen_flags: <defaults>
</compile_context>

<pallas_src>
import functools

import jax
import jax.numpy as jnp
from jax import lax
from jax.experimental import pallas as pl
from jax.experimental.pallas import tpu as pltpu


def _round_up(x, m):
    return (x + m - 1) // m * m


def _normalize_diag_kernel(im_ref, s_ref, imn_ref, sn_ref, diag_ref,
                           *, batch, tile, has_padding):
    """L2-normalize one (tile, D) row block of im and s; emit paired diag."""
    r = pl.program_id(0)

    im = im_ref[...].astype(jnp.float32)
    s = s_ref[...].astype(jnp.float32)

    im_ss = jnp.sum(im * im, axis=1, keepdims=True)
    s_ss = jnp.sum(s * s, axis=1, keepdims=True)
    # multiply-by-rsqrt (EUP + VPU); zero rows (padding) -> 0, never NaN.
    im_inv = jnp.where(im_ss > 0.0, lax.rsqrt(im_ss), 0.0)
    s_inv = jnp.where(s_ss > 0.0, lax.rsqrt(s_ss), 0.0)
    imn = im * im_inv
    sn = s * s_inv

    imn_ref[...] = imn.astype(imn_ref.dtype)
    sn_ref[...] = sn.astype(sn_ref.dtype)

    diag = jnp.sum(imn * sn, axis=1, keepdims=True)            # (tile, 1) f32
    if has_padding:
        row = r * tile + lax.broadcasted_iota(jnp.int32, (tile, 1), 0)
        # Huge diag makes every padded-row own-direction hinge clamp to zero.
        diag = jnp.where(row < batch, diag, jnp.float32(1e30))
    diag_ref[...] = diag


def _contrastive_tile_kernel(imn_ref, sn_ref, dcol_ref, drow_ref,
                             out_ref, acc_ref,
                             *, margin, batch, tile, has_padding):
    i = pl.program_id(0)
    j = pl.program_id(1)

    @pl.when(j == 0)
    def _():
        acc_ref[0, 0] = jnp.float32(0.0)

    # scores[a, b] = <imn[i*tile + a], sn[j*tile + b]>; contract over D of both
    # operands -> no explicit transpose through the XLU before the MXU.
    scores = lax.dot_general(
        imn_ref[...], sn_ref[...],
        dimension_numbers=(((1,), (1,)), ((), ())),
        preferred_element_type=jnp.float32)                    # (tile, tile)

    d1 = dcol_ref[...]                                         # (tile, 1)
    d2 = drow_ref[...]                                         # (1, tile)

    base = scores if margin == 0.0 else scores + jnp.float32(margin)
    cost_s = jnp.maximum(base - d1, 0.0)                       # i2t direction
    cost_im = jnp.maximum(base - d2, 0.0)                      # t2i direction

    if has_padding:
        # Cross-direction padded rows/cols (own direction already killed by
        # the 1e30 diagonal written in the pre-pass).
        col = j * tile + lax.broadcasted_iota(jnp.int32, (1, tile), 1)
        row = i * tile + lax.broadcasted_iota(jnp.int32, (tile, 1), 0)
        cost_s = jnp.where(col < batch, cost_s, 0.0)
        cost_im = jnp.where(row < batch, cost_im, 0.0)

    acc_ref[0, 0] += jnp.sum(cost_s + cost_im)

    if margin > 0.0:
        # Each valid diagonal element contributes exactly `margin` to each
        # direction (scores[k,k] == d1[k] == d2[k]); remove it analytically
        # instead of building a (tile, tile) mask every step.
        @pl.when(i == j)
        def _():
            valid = jnp.minimum(jnp.int32(batch) - i * tile, jnp.int32(tile))
            acc_ref[0, 0] -= jnp.float32(2.0 * margin) * valid.astype(jnp.float32)

    @pl.when(j == pl.num_programs(1) - 1)
    def _():
        # One lane/sublane-aligned (8, 128) store per row-tile; only [0, 0]
        # is non-zero.
        r8 = lax.broadcasted_iota(jnp.int32, (8, 128), 0)
        c128 = lax.broadcasted_iota(jnp.int32, (8, 128), 1)
        out_ref[...] = jnp.where((r8 == 0) & (c128 == 0),
                                 acc_ref[0, 0], jnp.float32(0.0))


def contrastive_loss(s, im, *, margin=0.0, block=256, matmul_dtype=None):
    """s: (B, D) text embeddings, im: (B, D) image embeddings -> scalar loss.

    matmul_dtype=jnp.bfloat16 narrows only the normalized MXU operands
    (f32 accumulation, f32 diagonal); default None keeps strict f32 parity.
    """
    assert s.ndim == 2 and s.shape == im.shape
    assert block % 128 == 0, "block must be a multiple of 128"
    batch, dim = s.shape

    # Tile: multiple of 8 sublanes, capped at `block` (256 fills the 256x256
    # MXU on v6e/v7x; pass block=128 on v5e if desired).
    tile = min(int(block), _round_up(batch, 8))
    padded = _round_up(batch, tile)
    has_padding = padded != batch
    if has_padding:
        pad = ((0, padded - batch), (0, 0))
        s_p, im_p = jnp.pad(s, pad), jnp.pad(im, pad)
    else:
        s_p, im_p = s, im

    grid_r = padded // tile
    store_dtype = jnp.float32 if matmul_dtype is None else matmul_dtype

    # ---- Pass 1: normalize + diagonal (O(B*D)). ----
    row_spec = pl.BlockSpec((tile, dim), lambda r: (r, 0))
    imn, sn, diag_col = pl.pallas_call(
        functools.partial(_normalize_diag_kernel, batch=batch, tile=tile,
                          has_padding=has_padding),
        out_shape=(jax.ShapeDtypeStruct((padded, dim), store_dtype),
                   jax.ShapeDtypeStruct((padded, dim), store_dtype),
                   jax.ShapeDtypeStruct((padded, 1), jnp.float32)),
        grid_spec=pltpu.PrefetchScalarGridSpec(
            num_scalar_prefetch=0,
            grid=(grid_r,),
            in_specs=[row_spec, row_spec],
            out_specs=(row_spec, row_spec,
                       pl.BlockSpec((tile, 1), lambda r: (r, 0))),
        ),
        compiler_params=pltpu.CompilerParams(
            dimension_semantics=("parallel",)),
    )(im_p, s_p)

    # Lane-major copy of the diagonal for the d2 broadcast (O(B) relayout).
    diag_row = diag_col.reshape(1, padded)

    # ---- Pass 2: tiled hinge reduction (O(B^2*D)). ----
    kernel = functools.partial(
        _contrastive_tile_kernel, margin=float(margin), batch=batch,
        tile=tile, has_padding=has_padding)

    partials = pl.pallas_call(
        kernel,
        out_shape=jax.ShapeDtypeStruct((grid_r * 8, 128), jnp.float32),
        grid_spec=pltpu.PrefetchScalarGridSpec(
            num_scalar_prefetch=0,
            grid=(grid_r, grid_r),
            in_specs=[pl.BlockSpec((tile, dim), lambda i, j: (i, 0)),   # imn_i
                      pl.BlockSpec((tile, dim), lambda i, j: (j, 0)),   # sn_j
                      pl.BlockSpec((tile, 1), lambda i, j: (i, 0)),     # d1
                      pl.BlockSpec((1, tile), lambda i, j: (0, j))],    # d2
            out_specs=pl.BlockSpec((8, 128), lambda i, j: (i, 0)),
            scratch_shapes=[pltpu.SMEM((1, 1), jnp.float32)],
        ),
        compiler_params=pltpu.CompilerParams(
            dimension_semantics=("parallel", "arbitrary"),
            vmem_limit_bytes=48 * 1024 * 1024),
    )(imn, sn, diag_col, diag_row)

    # Each row-tile contributed one non-zero element; everything else is 0.
    return jnp.sum(partials)


def _reference_loss(s, im, margin=0.0):
    """Pure-JAX reference mirroring the PyTorch forward (for verification)."""
    s32, im32 = s.astype(jnp.float32), im.astype(jnp.float32)
    sn = s32 / jnp.sqrt(jnp.sum(s32**2, axis=1, keepdims=True))
    imn = im32 / jnp.sqrt(jnp.sum(im32**2, axis=1, keepdims=True))
    scores = jnp.dot(imn, sn.T, precision=jax.lax.Precision.HIGHEST)
    diag = jnp.diag(scores)
    d1 = diag[:, None]
    d2 = diag[None, :]
    eye = jnp.eye(scores.shape[0], dtype=bool)
    cost_s = jnp.where(eye, 0.0, jnp.maximum(margin + scores - d1, 0.0))
    cost_im = jnp.where(eye, 0.0, jnp.maximum(margin + scores - d2, 0.0))
    return jnp.sum(cost_s) + jnp.sum(cost_im)


if __name__ == "__main__":
    key = jax.random.PRNGKey(0)
    k1, k2, k3, k4 = jax.random.split(key, 4)

    # Case 1: single-tile path (B=8, D=32), margin=0 (module defaults).
    s1 = jax.random.normal(k1, (8, 32), dtype=jnp.float32)
    im1 = jax.random.normal(k2, (8, 32), dtype=jnp.float32)
    out1 = jax.block_until_ready(contrastive_loss(s1, im1, margin=0.0))
    ref1 = jax.block_until_ready(_reference_loss(s1, im1, margin=0.0))
    assert jnp.allclose(out1, ref1, rtol=1e-5, atol=1e-4), (out1, ref1)

    # Case 2: multi-tile + row-padding path (B=200, D=128, 2x2 grid), margin>0.
    s2 = jax.random.normal(k3, (200, 128), dtype=jnp.float32)
    im2 = jax.random.normal(k4, (200, 128), dtype=jnp.float32)
    out2 = jax.block_until_ready(
        contrastive_loss(s2, im2, margin=0.2, block=128))
    ref2 = jax.block_until_ready(_reference_loss(s2, im2, margin=0.2))
    assert jnp.allclose(out2, ref2, rtol=1e-4, atol=1e-2), (out2, ref2)

    # Case 3: bf16 MXU-operand path (f32 accumulation), loose tolerance.
    out3 = jax.block_until_ready(
        contrastive_loss(s2, im2, margin=0.2, block=128,
                         matmul_dtype=jnp.bfloat16))
    assert jnp.allclose(out3, ref2, rtol=2e-2, atol=1.0), (out3, ref2)

    print("KERNEL_OK")
</pallas_src>

<mosaic_0001>
module attributes {stable_mosaic.version = 11 : i64} {
  func.func @_normalize_diag_kernel(%arg0: i32, %arg1: memref<8x32xf32, #tpu.memory_space<vmem>>, %arg2: memref<8x32xf32, #tpu.memory_space<vmem>>, %arg3: memref<8x32xf32, #tpu.memory_space<vmem>>, %arg4: memref<8x32xf32, #tpu.memory_space<vmem>>, %arg5: memref<8x1xf32, #tpu.memory_space<vmem>>) attributes {dimension_semantics = [#tpu.dimension_semantics<parallel>], iteration_bounds = array<i64: 1>, scalar_prefetch = 0 : i64, scratch_operands = 0 : i64, tpu.core_type = #tpu.core_type<tc>, window_params = [{transform_indices = @transform_0, window_bounds = array<i64: 8, 32>}, {transform_indices = @transform_1, window_bounds = array<i64: 8, 32>}, {transform_indices = @transform_2, window_bounds = array<i64: 8, 32>}, {transform_indices = @transform_3, window_bounds = array<i64: 8, 32>}, {transform_indices = @transform_4, window_bounds = array<i64: 8, 1>}]} {
    %c0 = arith.constant 0 : index
    %c0_0 = arith.constant 0 : index
    %0 = vector.load %arg1[%c0, %c0_0] : memref<8x32xf32, #tpu.memory_space<vmem>>, vector<8x32xf32>
    %c0_1 = arith.constant 0 : index
    %c0_2 = arith.constant 0 : index
    %1 = vector.load %arg2[%c0_1, %c0_2] : memref<8x32xf32, #tpu.memory_space<vmem>>, vector<8x32xf32>
    %2 = arith.mulf %0, %0 : vector<8x32xf32>
    %cst = arith.constant dense<0.000000e+00> : vector<8xf32>
    %3 = vector.multi_reduction <add>, %2, %cst [1] : vector<8x32xf32> to vector<8xf32>
    %4 = vector.shape_cast %3 : vector<8xf32> to vector<8x1xf32>
    %5 = arith.mulf %1, %1 : vector<8x32xf32>
    %cst_3 = arith.constant dense<0.000000e+00> : vector<8xf32>
    %6 = vector.multi_reduction <add>, %5, %cst_3 [1] : vector<8x32xf32> to vector<8xf32>
    %7 = vector.shape_cast %6 : vector<8xf32> to vector<8x1xf32>
    %cst_4 = arith.constant 0.000000e+00 : f32
    %8 = vector.broadcast %cst_4 : f32 to vector<8x1xf32>
    %9 = arith.cmpf ogt, %4, %8 : vector<8x1xf32>
    %10 = math.rsqrt %4 : vector<8x1xf32>
    %cst_5 = arith.constant 0.000000e+00 : f32
    %11 = vector.broadcast %cst_5 : f32 to vector<8x1xf32>
    %12 = arith.select %9, %10, %11 : vector<8x1xi1>, vector<8x1xf32>
    %cst_6 = arith.constant 0.000000e+00 : f32
    %13 = vector.broadcast %cst_6 : f32 to vector<8x1xf32>
    %14 = arith.cmpf ogt, %7, %13 : vector<8x1xf32>
    %15 = math.rsqrt %7 : vector<8x1xf32>
    %cst_7 = arith.constant 0.000000e+00 : f32
    %16 = vector.broadcast %cst_7 : f32 to vector<8x1xf32>
    %17 = arith.select %14, %15, %16 : vector<8x1xi1>, vector<8x1xf32>
    %18 = vector.broadcast %12 : vector<8x1xf32> to vector<8x32xf32>
    %19 = arith.mulf %0, %18 : vector<8x32xf32>
    %20 = vector.broadcast %17 : vector<8x1xf32> to vector<8x32xf32>
    %21 = arith.mulf %1, %20 : vector<8x32xf32>
    %c0_8 = arith.constant 0 : index
    %c0_9 = arith.constant 0 : index
    %22 = vector.load %arg3[%c0_8, %c0_9] : memref<8x32xf32, #tpu.memory_space<vmem>>, vector<8x32xf32>
    tpu.vector_store %arg3[%c0_8, %c0_9], %19 {strides = array<i32>} : memref<8x32xf32, #tpu.memory_space<vmem>>, vector<8x32xf32>,
    %c0_10 = arith.constant 0 : index
    %c0_11 = arith.constant 0 : index
    %23 = vector.load %arg4[%c0_10, %c0_11] : memref<8x32xf32, #tpu.memory_space<vmem>>, vector<8x32xf32>
    tpu.vector_store %arg4[%c0_10, %c0_11], %21 {strides = array<i32>} : memref<8x32xf32, #tpu.memory_space<vmem>>, vector<8x32xf32>,
    %24 = arith.mulf %19, %21 : vector<8x32xf32>
    %cst_12 = arith.constant dense<0.000000e+00> : vector<8xf32>
    %25 = vector.multi_reduction <add>, %24, %cst_12 [1] : vector<8x32xf32> to vector<8xf32>
    %26 = vector.shape_cast %25 : vector<8xf32> to vector<8x1xf32>
    %c0_13 = arith.constant 0 : index
    %c0_14 = arith.constant 0 : index
    %27 = vector.load %arg5[%c0_13, %c0_14] : memref<8x1xf32, #tpu.memory_space<vmem>>, vector<8x1xf32>
    tpu.vector_store %arg5[%c0_13, %c0_14], %26 {strides = array<i32>} : memref<8x1xf32, #tpu.memory_space<vmem>>, vector<8x1xf32>,
    return
  }
  func.func @transform_0(%arg0: i32) -> (i32, i32) {
    %c0_i32 = arith.constant 0 : i32
    %c0_i32_0 = arith.constant 0 : i32
    return %arg0, %c0_i32 : i32, i32
  }
  func.func @transform_1(%arg0: i32) -> (i32, i32) {
    %c0_i32 = arith.constant 0 : i32
    %c0_i32_0 = arith.constant 0 : i32
    return %arg0, %c0_i32 : i32, i32
  }
  func.func @transform_2(%arg0: i32) -> (i32, i32) {
    %c0_i32 = arith.constant 0 : i32
    %c0_i32_0 = arith.constant 0 : i32
    return %arg0, %c0_i32 : i32, i32
  }
  func.func @transform_3(%arg0: i32) -> (i32, i32) {
    %c0_i32 = arith.constant 0 : i32
    %c0_i32_0 = arith.constant 0 : i32
    return %arg0, %c0_i32 : i32, i32
  }
  func.func @transform_4(%arg0: i32) -> (i32, i32) {
    %c0_i32 = arith.constant 0 : i32
    %c0_i32_0 = arith.constant 0 : i32
    return %arg0, %c0_i32 : i32, i32
  }
}

</mosaic_0001>

<bundles_post_ra>
// kernel: tpu_custom_call.1
= control target key start
LH: loop header
LB: loop body
LE: loop exit
PB: predicated region body
PF: predicated region fallthrough
CT: control target
= control target key end

     0   :  { %10 = vsyncpa [#allocation3], 0  ;;  %s290_s0 = inlined_call_operand.hbm [shape: f32[8,32], index: 0, kind: input, shape index: {}]   ;;  %s291_s1 = inlined_call_operand.hbm [shape: f32[8,32], index: 1, kind: input, shape index: {}]   ;;  %s292_s2 = inlined_call_operand.hbm [shape: f32[8,32], index: 2, kind: output, shape index: {0}]   ;;  %s293_s3 = inlined_call_operand.hbm [shape: f32[8,32], index: 3, kind: output, shape index: {1}]   ;;  %s294_s4 = inlined_call_operand.vmem [shape: f32[8,1], index: 4, kind: output, shape index: {2}]  }
   0x1   :  { %11 = vsyncpa [#allocation6], 0 }
   0x2   :  { %12 = vsyncpa [#allocation4], 0 }
   0x3   :  { %13 = vsyncpa [#allocation9], 0  ;;  %s205_s15 = smov [#allocation2]   ;;  %s206_s17 = smov [#allocation5]  }
   0x4   :  { %s20_s16 = sshll.u32 %s205_s15, 4  ;;  %s30_s18 = sshll.u32 %s206_s17, 4  ;;  %s21_s16 = int_to_ptr.vmem [resolvable:$true] %s20_s16  ;;  %s31_s18 = int_to_ptr.vmem [resolvable:$true] %s30_s18 }
   0x5   :  { %s109_s21 = scalar_lea.hbm %s290_s0, 128 }
   0x6   :  { %p110_p0 = scmp.ne.s32.totalorder %s290_s0, %s109_s21  ;;  %p113_p1 = scmp.lt.u32.totalorder %s109_s21, %s290_s0 }
   0x8   :  { %p115_p2 = pnand %p113_p1, %p110_p0 }
   0xa   :  { %118 = shalt.err (!%p115_p2)
}
   0xb   :  { %s119_s26 = scalar_lea.vmem %s21_s16, 128  ;;  %p124_p4 = scmp.lt.s32.totalorder %s21_s16, %s21_s16 }
   0xc   :  { %p120_p3 = scmp.ne.s32.totalorder %s21_s16, %s119_s26  ;;  %p125_p5 = scmp.lt.s32.totalorder %s119_s26, %s119_s26 }
   0xe   :  { %p126_p6 = por %p125_p5, %p124_p4 }
  0x10   :  { %p127_p7 = pnand %p126_p6, %p120_p3 }
  0x12   :  { %130 = shalt.err (!%p127_p7)
}
  0x13   :  { %23 = dma.hbm_to_vmem [thread:$0]  %s290_s0, 128, %s21_s16, [#allocation3]  }
  0x14   :  { %s131_s5 = scalar_lea.hbm %s291_s1, 128 }
  0x15   :  { %p132_p8 = scmp.ne.s32.totalorder %s291_s1, %s131_s5  ;;  %p135_p9 = scmp.lt.u32.totalorder %s131_s5, %s291_s1 }
  0x17   :  { %p137_p10 = pnand %p135_p9, %p132_p8 }
  0x19   :  { %140 = shalt.err (!%p137_p10)
}
  0x1a   :  { %s141_s10 = scalar_lea.vmem %s31_s18, 128  ;;  %p146_p12 = scmp.lt.s32.totalorder %s31_s18, %s31_s18 }
  0x1b   :  { %p142_p11 = scmp.ne.s32.totalorder %s31_s18, %s141_s10  ;;  %p147_p13 = scmp.lt.s32.totalorder %s141_s10, %s141_s10 }
  0x1d   :  { %p148_p0 = por %p147_p13, %p146_p12 }
  0x1f   :  { %p149_p1 = pnand %p148_p0, %p142_p11 }
  0x21   :  { %152 = shalt.err (!%p149_p1)
}
  0x22   :  { %33 = dma.hbm_to_vmem [thread:$0]  %s291_s1, 128, %s31_s18, [#allocation6]  }
  0x23   :  { %197 = dma.done.wait [#allocation3], 128  }
  0x24   :  { %198 = vsyncadd [#allocation3], 4294967168 }
  0x25   :  { %199 = dma.done.wait [#allocation6], 128  }
  0x26   :  { %200 = vsyncadd [#allocation6], 4294967168  ;;  %v40_v0 = vld [vmem:[#allocation2] sm:$0xff]  ;;  %vm43_vm0 = vcmask 261120   ;;  %v41_v1 = vld [vmem:[#allocation5] sm:$0xff]  ;;  %s207_s1 = smov [#allocation7]  }
  0x27   :  { %v42_v2 = vmul.f32 %v40_v0, %v40_v0  ;;  %v47_v3 = vmul.f32 %v41_v1, %v41_v1  ;;  %s73_s12 = sshll.u32 %s207_s1, 4  ;;  %s208_s13 = smov [#allocation8]   ;;  %s74_s12 = int_to_ptr.vmem [resolvable:$true] %s73_s12 }
  0x28   :  { %s83_s14 = sshll.u32 %s208_s13, 4  ;;  %s153_s15 = scalar_lea.vmem %s74_s12, 128  ;;  %s84_s14 = int_to_ptr.vmem [resolvable:$true] %s83_s14 }
  0x29   :  { %v44_v4 = vsel %vm43_vm0, %v42_v2, 0.0  ;;  %v48_v5 = vsel %vm43_vm0, %v47_v3, 0.0  ;;  %p154_p2 = scmp.ne.s32.totalorder %s74_s12, %s153_s15  ;;  %p158_p3 = scmp.lt.s32.totalorder %s74_s12, %s74_s12 }
  0x2a   :  { %45 = vadd.xlane.f32.xlu0 %v44_v4  ;;  %p159_p4 = scmp.lt.s32.totalorder %s153_s15, %s153_s15 }
  0x2c   :  { %p160_p5 = por %p159_p4, %p158_p3 }
  0x2e   :  { %49 = vadd.xlane.f32.xlu0 %v48_v5  ;;  %p161_p6 = pnand %p160_p5, %p154_p2 }
  0xb7   :  { %v46_v6 = vpop.xlane.xlu0 %45 }
  0xb8   :  { %105 = vrsqrt.f32 %v46_v6  ;;  %vm51_vm1 = vcmp.gt.f32.partialorder %v46_v6, 0.0 }
  0xbb   :  { %v50_v7 = vpop.xlane.xlu0 %49 }
  0xbc   :  { %107 = vrsqrt.f32 %v50_v7  ;;  %vm54_vm2 = vcmp.gt.f32.partialorder %v50_v7, 0.0 }
  0xc2   :  { %v106_v8 = vpop.eup %105 }
  0xc3   :  { %v53_v9 = vsel %vm51_vm1, %v106_v8, 0.0 }
  0xc4   :  { %v57_v10 = vmul.f32 %v53_v9, %v40_v0 }
  0xc6   :  { %v108_v11 = vpop.eup %107  ;;  %59 = vst.msk [vmem:[#allocation7] sm:$0xff] %vm43_vm0, %v57_v10 }
  0xc7   :  { %v56_v12 = vsel %vm54_vm2, %v108_v11, 0.0 }
  0xc8   :  { %v58_v13 = vmul.f32 %v56_v12, %v41_v1 }
  0xca   :  { %60 = vst.msk [vmem:[#allocation8] sm:$0xff] %vm43_vm0, %v58_v13  ;;  %v61_v14 = vmul.f32 %v58_v13, %v57_v10 }
  0xcc   :  { %v62_v15 = vsel %vm43_vm0, %v61_v14, 0.0 }
  0xcd   :  { %63 = vadd.xlane.f32.xlu1 %v62_v15 }
  0xce   :  { %164 = shalt.err (!%p161_p6)
}
  0xcf   :  { %s165_s18 = scalar_lea.hbm %s292_s2, 128 }
  0xd0   :  { %p166_p7 = scmp.ne.s32.totalorder %s292_s2, %s165_s18  ;;  %p169_p8 = scmp.lt.u32.totalorder %s165_s18, %s292_s2 }
  0xd2   :  { %p171_p9 = pnand %p169_p8, %p166_p7 }
  0xd4   :  { %174 = shalt.err (!%p171_p9)
}
  0xd5   :  { %76 = dma.vmem_to_hbm [thread:$0]  %s74_s12, 128, %s292_s2, [#allocation4]  }
  0xd6   :  { %s175_s25 = scalar_lea.vmem %s84_s14, 128  ;;  %p180_p11 = scmp.lt.s32.totalorder %s84_s14, %s84_s14 }
  0xd7   :  { %p176_p10 = scmp.ne.s32.totalorder %s84_s14, %s175_s25  ;;  %p181_p12 = scmp.lt.s32.totalorder %s175_s25, %s175_s25 }
  0xd9   :  { %p182_p13 = por %p181_p12, %p180_p11 }
  0xdb   :  { %p183_p0 = pnand %p182_p13, %p176_p10 }
  0xdd   :  { %186 = shalt.err (!%p183_p0)
}
  0xde   :  { %s187_s28 = scalar_lea.hbm %s293_s3, 128 }
  0xdf   :  { %p188_p1 = scmp.ne.s32.totalorder %s293_s3, %s187_s28  ;;  %p191_p2 = scmp.lt.u32.totalorder %s187_s28, %s293_s3 }
  0xe1   :  { %p193_p3 = pnand %p191_p2, %p188_p1 }
  0xe3   :  { %196 = shalt.err (!%p193_p3)
}
  0xe4   :  { %86 = dma.vmem_to_hbm [thread:$0]  %s84_s14, 128, %s293_s3, [#allocation9]   ;;  %vm65_vm3 = vcmask 7168  }
 0x15a   :  { %v64_v16 = vpop.xlane.xlu1 %63 }
 0x15b   :  { %66 = vst.msk [vmem:[%s294_s4] sm:$0xff] %vm65_vm3, %v64_v16 }
 0x15c   :  { %201 = dma.done.wait [#allocation4], 128  }
 0x15d   :  { %202 = vsyncadd [#allocation4], 4294967168 }
 0x15e   :  { %203 = dma.done.wait [#allocation9], 128  }
 0x15f   :  { %204 = vsyncadd [#allocation9], 4294967168 }
 0x160   :  { %97 = vsyncpa [#allocation3], 1 }
 0x161   :  { %98 = vsyncpa [#allocation6], 1 }
 0x162   :  { %99 = vsyncpa [#allocation4], 1 }
 0x163   :  { %100 = vsyncpa [#allocation9], 1 }

</bundles_post_ra>
